<compile_context>
chip_gen: v5e
topology: v5e:2x2
jax: 0.10.0
libtpu: 0.0.40
codegen_flags: <defaults>
</compile_context>

<pallas_src>
import numpy as np
import jax
import jax.numpy as jnp
from jax.experimental import pallas as pl
from jax.experimental.pallas import tpu as pltpu

EPS = 1e-5                       # BatchNorm eps
_VMEM_LIMIT = 64 * 1024 * 1024   # safe scoped-VMEM cap on v5e/v6e/v7x


def _bilinear_matrix(n_in: int) -> jnp.ndarray:
    """(2*n_in, n_in) matrix reproducing nn.Upsample(scale_factor=2, bilinear,
    align_corners=False) along one axis (PyTorch source-index convention)."""
    n_out = 2 * n_in
    A = np.zeros((n_out, n_in), np.float32)
    for i in range(n_out):
        src = max((i + 0.5) * 0.5 - 0.5, 0.0)
        i0 = min(int(np.floor(src)), n_in - 1)
        i1 = min(i0 + 1, n_in - 1)
        lam = src - i0
        A[i, i0] += 1.0 - lam
        A[i, i1] += lam
    return jnp.asarray(A)


# ---------------------------------------------------------------------------
# Fused kernel: one batch element per grid step.
#   upsample x1 (W via MXU matmul, H via exact 0.75/0.25 VPU blend), concat
#   with x2 on flattened spatial, build 3 dx slabs, 3 accumulating bf16 MXU
#   matmuls for the 3x3 conv, bias+ReLU, 1x1 bf16 matmul, bias+ReLU, store.
# ---------------------------------------------------------------------------
def _up_fused_kernel(x2_ref, x1_ref, aw_ref, w3_ref, w1_ref, cb_ref, o_ref):
    C2, HW = x2_ref.shape[1], x2_ref.shape[2]
    C1, H, W = x1_ref.shape[1], x1_ref.shape[2], x1_ref.shape[3]
    W2 = aw_ref.shape[1]
    C3 = w3_ref.shape[1]
    Cout = w1_ref.shape[0]
    Cin = C1 + C2
    P = W2 + 1                                   # zero guard per side (lanes)
    HWE = HW + 2 * P

    # ---- bilinear 2x upsample of the x1 tile (fused, no HBM round trip) ----
    x1b = x1_ref[0].reshape(C1 * H, W).astype(jnp.bfloat16)
    t = jnp.dot(x1b, aw_ref[...], preferred_element_type=jnp.float32)     # (C1*H, W2)
    t = t.reshape(C1, H, W2)
    prev = jnp.concatenate([t[:, :1, :], t[:, :-1, :]], axis=1)           # row y-1 (clamped)
    nxt = jnp.concatenate([t[:, 1:, :], t[:, -1:, :]], axis=1)            # row y+1 (clamped)
    pair = jnp.concatenate([0.75 * t + 0.25 * prev,                       # output rows 2y
                            0.75 * t + 0.25 * nxt],                       # output rows 2y+1
                           axis=-1)                                       # (C1, H, 2*W2)
    # flatten (H2, W2) -> H2*W2 via lane concat of the per-source-row pairs
    # (guaranteed-lowering alternative to a minor-dim reshape).
    x1u = jnp.concatenate([pair[:, r, :] for r in range(H)], axis=-1)     # (C1, HW)

    # ---- torch.cat([x2, x1_up], dim=1) on flattened spatial, zero-extended ----
    xf = jnp.concatenate([x2_ref[0].astype(jnp.float32), x1u], axis=0)    # (Cin, HW)
    zpad = jnp.zeros((Cin, P), jnp.float32)
    xe = jnp.concatenate([zpad, xf, zpad], axis=1)                        # (Cin, HWE)

    # dx = -1 / +1 shifted copies; column-boundary masks from an in-kernel iota.
    j = jax.lax.broadcasted_iota(jnp.int32, (1, HWE), 1)
    keep_l = ((j + (W2 - 1)) % W2) != 0          # kills output col 0      (dx = -1)
    keep_r = (j % W2) != 0                       # kills output col W2-1   (dx = +1)
    zcol = jnp.zeros((Cin, 1), jnp.float32)
    ye_l = jnp.where(keep_l, jnp.concatenate([zcol, xe[:, :-1]], axis=1), 0.0)
    ye_r = jnp.where(keep_r, jnp.concatenate([xe[:, 1:], zcol], axis=1), 0.0)

    # packed dx slabs: channel blocks ordered kx = 0, 1, 2 (matches w3 layout)
    E = jnp.concatenate([ye_l, xe, ye_r], axis=0).astype(jnp.bfloat16)    # (3*Cin, HWE)

    # 3x3 conv (BN1 scale pre-folded into w3) as 3 accumulating MXU matmuls,
    # grouped by ky; each dy tap is a static lane slice of E at offset ky*W2+1.
    z = jnp.dot(w3_ref[0], E[:, 1:1 + HW], preferred_element_type=jnp.float32)
    z = z + jnp.dot(w3_ref[1], E[:, W2 + 1:W2 + 1 + HW],
                    preferred_element_type=jnp.float32)
    z = z + jnp.dot(w3_ref[2], E[:, 2 * W2 + 1:2 * W2 + 1 + HW],
                    preferred_element_type=jnp.float32)
    z = jnp.maximum(z + cb_ref[0:C3, :], 0.0)                             # BN1 bias + ReLU

    # 1x1 conv (BN2 scale pre-folded into w1) + bias + ReLU
    y = jnp.dot(w1_ref[...], z.astype(jnp.bfloat16),
                preferred_element_type=jnp.float32)                       # (Cout, HW)
    y = jnp.maximum(y + cb_ref[C3:C3 + Cout, :], 0.0)                     # BN2 bias + ReLU
    o_ref[...] = y[None].astype(o_ref.dtype)                              # lane-dense store


# ---------------------------------------------------------------------------
# Wrapper: equivalent of Up.forward(x1, x2)
# ---------------------------------------------------------------------------
def up_forward(x1, x2, params):
    """x1: (B, C1, H, W), x2: (B, C2, 2H, 2W) NCHW -> (B, Cout, 2H, 2W) NCHW."""
    B, C1, H, W = x1.shape
    _, C2, H2, W2 = x2.shape
    assert (H2, W2) == (2 * H, 2 * W)
    Cin = C1 + C2
    C3 = params["w3x3"].shape[0]          # 3x3 conv output channels (== Cin)
    Cout = params["w1x1"].shape[0]
    HW = H2 * W2

    # free contiguous reshape (no data movement); no dtype upcast of inputs
    x2f = x2.reshape(B, C2, HW)

    # bilinear W-interpolation matrix (exact 0.25/0.75 weights -> bf16 exact)
    aw = _bilinear_matrix(W).T.astype(jnp.bfloat16)                   # (W, 2W)

    # ---- fold conv bias + eval-mode BN: scales into weights, biases packed ----
    s1 = params["g1"] / jnp.sqrt(params["v1"] + EPS)
    c1 = (params["b3x3"] - params["m1"]) * s1 + params["be1"]
    s2 = params["g2"] / jnp.sqrt(params["v2"] + EPS)
    c2 = (params["b1x1"] - params["m2"]) * s2 + params["be2"]
    # (C3, Cin, 3, 3) -> (ky, C3, kx*Cin + ci), scaled by s1, bf16 for the MXU
    w3r = (jnp.transpose(params["w3x3"], (2, 0, 3, 1)).reshape(C3, -1)  # keep o major
           .reshape(C3, 3 * 3 * Cin))  # placeholder, replaced below
    w3r = (jnp.transpose(params["w3x3"], (2, 0, 3, 1)).reshape(3, C3, 3 * Cin)
           * s1[None, :, None]).astype(jnp.bfloat16)
    w1r = (params["w1x1"][:, :, 0, 0] * s2[:, None]).astype(jnp.bfloat16)  # (Cout, C3)
    cb = jnp.concatenate([c1, c2])[:, None].astype(jnp.float32)            # (C3+Cout, 1)

    out_flat = pl.pallas_call(
        _up_fused_kernel,
        out_shape=jax.ShapeDtypeStruct((B, Cout, HW), jnp.float32),
        grid=(B,),
        in_specs=[
            pl.BlockSpec((1, C2, HW), lambda b: (b, 0, 0)),
            pl.BlockSpec((1, C1, H, W), lambda b: (b, 0, 0, 0)),
            pl.BlockSpec((W, W2), lambda b: (0, 0)),
            pl.BlockSpec((3, C3, 3 * Cin), lambda b: (0, 0, 0)),
            pl.BlockSpec((Cout, C3), lambda b: (0, 0)),
            pl.BlockSpec((C3 + Cout, 1), lambda b: (0, 0)),
        ],
        out_specs=pl.BlockSpec((1, Cout, HW), lambda b: (b, 0, 0)),
        compiler_params=pltpu.CompilerParams(
            dimension_semantics=("parallel",),
            vmem_limit_bytes=_VMEM_LIMIT),
    )(x2f, x1, aw, w3r, w1r, cb)

    # free reshape back to NCHW spatial
    return out_flat.reshape(B, Cout, H2, W2)


# ---------------------------------------------------------------------------
# Deterministic parameter init (shapes from Up.__init__) and a pure-JAX reference.
# ---------------------------------------------------------------------------
def init_params(key, in_channels, out_channels):
    ks = jax.random.split(key, 10)
    return {
        "w3x3": 0.1 * jax.random.normal(ks[0], (in_channels, in_channels, 3, 3), jnp.float32),
        "b3x3": 0.1 * jax.random.normal(ks[1], (in_channels,), jnp.float32),
        "g1":   1.0 + 0.1 * jax.random.normal(ks[2], (in_channels,), jnp.float32),
        "be1":  0.1 * jax.random.normal(ks[3], (in_channels,), jnp.float32),
        "m1":   0.1 * jax.random.normal(ks[4], (in_channels,), jnp.float32),
        "v1":   1.0 + 0.1 * jnp.abs(jax.random.normal(ks[5], (in_channels,), jnp.float32)),
        "w1x1": 0.1 * jax.random.normal(ks[6], (out_channels, in_channels, 1, 1), jnp.float32),
        "b1x1": 0.1 * jax.random.normal(ks[7], (out_channels,), jnp.float32),
        "g2":   1.0 + 0.1 * jax.random.normal(ks[8], (out_channels,), jnp.float32),
        "be2":  0.1 * jax.random.normal(ks[9], (out_channels,), jnp.float32),
        "m2":   jnp.zeros((out_channels,), jnp.float32),
        "v2":   jnp.ones((out_channels,), jnp.float32),
    }


def up_reference(x1, x2, p):
    B, C1, H, W = x1.shape
    ah, aw = _bilinear_matrix(H), _bilinear_matrix(W)
    x1u = jnp.einsum('ih,jw,bchw->bcij', ah, aw, x1,
                     precision=jax.lax.Precision.HIGHEST)
    x = jnp.concatenate([x2, x1u], axis=1)
    dn = ('NCHW', 'OIHW', 'NCHW')
    y = jax.lax.conv_general_dilated(x, p["w3x3"], (1, 1), ((1, 1), (1, 1)),
                                     dimension_numbers=dn,
                                     precision=jax.lax.Precision.HIGHEST)
    y = y + p["b3x3"][None, :, None, None]
    y = (y - p["m1"][None, :, None, None]) / jnp.sqrt(p["v1"][None, :, None, None] + EPS)
    y = jnp.maximum(y * p["g1"][None, :, None, None] + p["be1"][None, :, None, None], 0.0)
    y = jax.lax.conv_general_dilated(y, p["w1x1"], (1, 1), ((0, 0), (0, 0)),
                                     dimension_numbers=dn,
                                     precision=jax.lax.Precision.HIGHEST)
    y = y + p["b1x1"][None, :, None, None]
    y = (y - p["m2"][None, :, None, None]) / jnp.sqrt(p["v2"][None, :, None, None] + EPS)
    return jnp.maximum(y * p["g2"][None, :, None, None] + p["be2"][None, :, None, None], 0.0)


if __name__ == "__main__":
    key = jax.random.PRNGKey(0)
    B, C1, C2 = 2, 4, 4          # in_channels = C1 + C2 = 8 (post-concat)
    H, W = 8, 8                  # x1 spatial; x2 is 2x larger
    Cout = 16
    k1, k2, kp = jax.random.split(key, 3)
    x1 = jax.random.normal(k1, (B, C1, H, W), jnp.float32)
    x2 = jax.random.normal(k2, (B, C2, 2 * H, 2 * W), jnp.float32)
    params = init_params(kp, C1 + C2, Cout)

    out = up_forward(x1, x2, params)
    out = jax.block_until_ready(out)
    assert out.shape == (B, Cout, 2 * H, 2 * W), out.shape

    ref = up_reference(x1, x2, params)
    # bf16 MXU operands with f32 accumulation -> relaxed tolerance vs f32 reference
    np.testing.assert_allclose(np.asarray(out), np.asarray(ref), rtol=3e-2, atol=3e-2)
    print("KERNEL_OK")
</pallas_src>

<mosaic_0001>
module attributes {stable_mosaic.version = 11 : i64} {
  func.func @_up_fused_kernel(%arg0: i32, %arg1: memref<1x4x256xf32, #tpu.memory_space<vmem>>, %arg2: memref<1x4x8x8xf32, #tpu.memory_space<vmem>>, %arg3: memref<8x16xbf16, #tpu.memory_space<vmem>>, %arg4: memref<3x8x24xbf16, #tpu.memory_space<vmem>>, %arg5: memref<16x8xbf16, #tpu.memory_space<vmem>>, %arg6: memref<24x1xf32, #tpu.memory_space<vmem>>, %arg7: memref<1x16x256xf32, #tpu.memory_space<vmem>>) attributes {dimension_semantics = [#tpu.dimension_semantics<parallel>], iteration_bounds = array<i64: 2>, scalar_prefetch = 0 : i64, scratch_operands = 0 : i64, tpu.core_type = #tpu.core_type<tc>, window_params = [{transform_indices = @transform_0, window_bounds = array<i64: 1, 4, 256>}, {transform_indices = @transform_1, window_bounds = array<i64: 1, 4, 8, 8>}, {pipeline_mode = #tpu.pipeline_mode<synchronous>, transform_indices = @transform_2, window_bounds = array<i64: 8, 16>}, {pipeline_mode = #tpu.pipeline_mode<synchronous>, transform_indices = @transform_3, window_bounds = array<i64: 3, 8, 24>}, {pipeline_mode = #tpu.pipeline_mode<synchronous>, transform_indices = @transform_4, window_bounds = array<i64: 16, 8>}, {pipeline_mode = #tpu.pipeline_mode<synchronous>, transform_indices = @transform_5, window_bounds = array<i64: 24, 1>}, {transform_indices = @transform_6, window_bounds = array<i64: 1, 16, 256>}]} {
    %c0 = arith.constant 0 : index
    %c0_0 = arith.constant 0 : index
    %c0_1 = arith.constant 0 : index
    %c0_2 = arith.constant 0 : index
    %0 = vector.load %arg2[%c0, %c0_0, %c0_1, %c0_2] : memref<1x4x8x8xf32, #tpu.memory_space<vmem>>, vector<1x4x8x8xf32>
    %1 = vector.shape_cast %0 : vector<1x4x8x8xf32> to vector<4x8x8xf32>
    %2 = vector.shape_cast %1 : vector<4x8x8xf32> to vector<32x8xf32>
    %3 = arith.truncf %2 : vector<32x8xf32> to vector<32x8xbf16>
    %c0_3 = arith.constant 0 : index
    %c0_4 = arith.constant 0 : index
    %4 = vector.load %arg3[%c0_3, %c0_4] : memref<8x16xbf16, #tpu.memory_space<vmem>>, vector<8x16xbf16>
    %cst = arith.constant dense<0.000000e+00> : vector<32x16xf32>
    %5 = tpu.matmul %3, %4, %cst {dimension_numbers = #tpu.dot_dimension_numbers<[1], [0], [0], [1], [0, 0, 1, 1], [], []>} : vector<32x8xbf16>, vector<8x16xbf16>, vector<32x16xf32> -> vector<32x16xf32>
    %6 = vector.shape_cast %5 : vector<32x16xf32> to vector<4x8x16xf32>
    %7 = vector.extract_strided_slice %6 {offsets = [0, 0, 0], sizes = [4, 1, 16], strides = [1, 1, 1]} : vector<4x8x16xf32> to vector<4x1x16xf32>
    %8 = vector.extract_strided_slice %6 {offsets = [0, 0, 0], sizes = [4, 7, 16], strides = [1, 1, 1]} : vector<4x8x16xf32> to vector<4x7x16xf32>
    %9 = tpu.concatenate %7, %8 in 1 : vector<4x1x16xf32>, vector<4x7x16xf32> -> vector<4x8x16xf32>
    %10 = vector.extract_strided_slice %6 {offsets = [0, 1, 0], sizes = [4, 7, 16], strides = [1, 1, 1]} : vector<4x8x16xf32> to vector<4x7x16xf32>
    %11 = vector.extract_strided_slice %6 {offsets = [0, 7, 0], sizes = [4, 1, 16], strides = [1, 1, 1]} : vector<4x8x16xf32> to vector<4x1x16xf32>
    %12 = tpu.concatenate %10, %11 in 1 : vector<4x7x16xf32>, vector<4x1x16xf32> -> vector<4x8x16xf32>
    %cst_5 = arith.constant 7.500000e-01 : f32
    %13 = vector.broadcast %cst_5 : f32 to vector<4x8x16xf32>
    %14 = arith.mulf %13, %6 : vector<4x8x16xf32>
    %cst_6 = arith.constant 2.500000e-01 : f32
    %15 = vector.broadcast %cst_6 : f32 to vector<4x8x16xf32>
    %16 = arith.mulf %15, %9 : vector<4x8x16xf32>
    %17 = arith.addf %14, %16 : vector<4x8x16xf32>
    %cst_7 = arith.constant 7.500000e-01 : f32
    %18 = vector.broadcast %cst_7 : f32 to vector<4x8x16xf32>
    %19 = arith.mulf %18, %6 : vector<4x8x16xf32>
    %cst_8 = arith.constant 2.500000e-01 : f32
    %20 = vector.broadcast %cst_8 : f32 to vector<4x8x16xf32>
    %21 = arith.mulf %20, %12 : vector<4x8x16xf32>
    %22 = arith.addf %19, %21 : vector<4x8x16xf32>
    %23 = tpu.concatenate %17, %22 in 2 : vector<4x8x16xf32>, vector<4x8x16xf32> -> vector<4x8x32xf32>
    %24 = vector.extract_strided_slice %23 {offsets = [0, 0, 0], sizes = [4, 1, 32], strides = [1, 1, 1]} : vector<4x8x32xf32> to vector<4x1x32xf32>
    %25 = vector.shape_cast %24 : vector<4x1x32xf32> to vector<4x32xf32>
    %26 = vector.extract_strided_slice %23 {offsets = [0, 1, 0], sizes = [4, 1, 32], strides = [1, 1, 1]} : vector<4x8x32xf32> to vector<4x1x32xf32>
    %27 = vector.shape_cast %26 : vector<4x1x32xf32> to vector<4x32xf32>
    %28 = vector.extract_strided_slice %23 {offsets = [0, 2, 0], sizes = [4, 1, 32], strides = [1, 1, 1]} : vector<4x8x32xf32> to vector<4x1x32xf32>
    %29 = vector.shape_cast %28 : vector<4x1x32xf32> to vector<4x32xf32>
    %30 = vector.extract_strided_slice %23 {offsets = [0, 3, 0], sizes = [4, 1, 32], strides = [1, 1, 1]} : vector<4x8x32xf32> to vector<4x1x32xf32>
    %31 = vector.shape_cast %30 : vector<4x1x32xf32> to vector<4x32xf32>
    %32 = vector.extract_strided_slice %23 {offsets = [0, 4, 0], sizes = [4, 1, 32], strides = [1, 1, 1]} : vector<4x8x32xf32> to vector<4x1x32xf32>
    %33 = vector.shape_cast %32 : vector<4x1x32xf32> to vector<4x32xf32>
    %34 = vector.extract_strided_slice %23 {offsets = [0, 5, 0], sizes = [4, 1, 32], strides = [1, 1, 1]} : vector<4x8x32xf32> to vector<4x1x32xf32>
    %35 = vector.shape_cast %34 : vector<4x1x32xf32> to vector<4x32xf32>
    %36 = vector.extract_strided_slice %23 {offsets = [0, 6, 0], sizes = [4, 1, 32], strides = [1, 1, 1]} : vector<4x8x32xf32> to vector<4x1x32xf32>
    %37 = vector.shape_cast %36 : vector<4x1x32xf32> to vector<4x32xf32>
    %38 = vector.extract_strided_slice %23 {offsets = [0, 7, 0], sizes = [4, 1, 32], strides = [1, 1, 1]} : vector<4x8x32xf32> to vector<4x1x32xf32>
    %39 = vector.shape_cast %38 : vector<4x1x32xf32> to vector<4x32xf32>
    %40 = tpu.concatenate %25, %27, %29, %31, %33, %35, %37, %39 in 1 : vector<4x32xf32>, vector<4x32xf32>, vector<4x32xf32>, vector<4x32xf32>, vector<4x32xf32>, vector<4x32xf32>, vector<4x32xf32>, vector<4x32xf32> -> vector<4x256xf32>
    %c0_9 = arith.constant 0 : index
    %c0_10 = arith.constant 0 : index
    %c0_11 = arith.constant 0 : index
    %41 = vector.load %arg1[%c0_9, %c0_10, %c0_11] : memref<1x4x256xf32, #tpu.memory_space<vmem>>, vector<1x4x256xf32>
    %42 = vector.shape_cast %41 : vector<1x4x256xf32> to vector<4x256xf32>
    %43 = tpu.concatenate %42, %40 in 0 : vector<4x256xf32>, vector<4x256xf32> -> vector<8x256xf32>
    %cst_12 = arith.constant 0.000000e+00 : f32
    %44 = vector.broadcast %cst_12 : f32 to vector<8x17xf32>
    %45 = tpu.concatenate %44, %43, %44 in 1 : vector<8x17xf32>, vector<8x256xf32>, vector<8x17xf32> -> vector<8x290xf32>
    %46 = tpu.iota {dimensions = array<i32: 1>} : vector<1x290xi32>
    %c15_i32 = arith.constant 15 : i32
    %47 = vector.broadcast %c15_i32 : i32 to vector<1x290xi32>
    %48 = arith.addi %46, %47 : vector<1x290xi32>
    %c16_i32 = arith.constant 16 : i32
    %c0_i32 = arith.constant 0 : i32
    %49 = arith.cmpi eq, %c16_i32, %c0_i32 : i32
    %c1_i32 = arith.constant 1 : i32
    %50 = arith.select %49, %c1_i32, %c16_i32 : i32
    %51 = vector.broadcast %50 : i32 to vector<1x290xi32>
    %52 = arith.remsi %48, %51 : vector<1x290xi32>
    %c0_i32_13 = arith.constant 0 : i32
    %53 = vector.broadcast %c0_i32_13 : i32 to vector<1x290xi32>
    %54 = arith.cmpi ne, %52, %53 : vector<1x290xi32>
    %c0_i32_14 = arith.constant 0 : i32
    %55 = vector.broadcast %c0_i32_14 : i32 to vector<1x290xi32>
    %56 = arith.cmpi slt, %52, %55 : vector<1x290xi32>
    %c0_i32_15 = arith.constant 0 : i32
    %57 = arith.cmpi slt, %50, %c0_i32_15 : i32
    %58 = vector.broadcast %57 : i1 to vector<1x290xi1>
    %59 = vector.broadcast %58 : vector<1x290xi1> to vector<1x290xi1>
    %60 = arith.xori %56, %59 : vector<1x290xi1>
    %61 = arith.andi %60, %54 : vector<1x290xi1>
    %62 = vector.broadcast %50 : i32 to vector<1x290xi32>
    %63 = arith.addi %52, %62 : vector<1x290xi32>
    %64 = arith.select %61, %63, %52 : vector<1x290xi1>, vector<1x290xi32>
    %c0_i32_16 = arith.constant 0 : i32
    %65 = vector.broadcast %c0_i32_16 : i32 to vector<1x290xi32>
    %66 = arith.cmpi ne, %64, %65 : vector<1x290xi32>
    %c16_i32_17 = arith.constant 16 : i32
    %c0_i32_18 = arith.constant 0 : i32
    %67 = arith.cmpi eq, %c16_i32_17, %c0_i32_18 : i32
    %c1_i32_19 = arith.constant 1 : i32
    %68 = arith.select %67, %c1_i32_19, %c16_i32_17 : i32
    %69 = vector.broadcast %68 : i32 to vector<1x290xi32>
    %70 = arith.remsi %46, %69 : vector<1x290xi32>
    %c0_i32_20 = arith.constant 0 : i32
    %71 = vector.broadcast %c0_i32_20 : i32 to vector<1x290xi32>
    %72 = arith.cmpi ne, %70, %71 : vector<1x290xi32>
    %c0_i32_21 = arith.constant 0 : i32
    %73 = vector.broadcast %c0_i32_21 : i32 to vector<1x290xi32>
    %74 = arith.cmpi slt, %70, %73 : vector<1x290xi32>
    %c0_i32_22 = arith.constant 0 : i32
    %75 = arith.cmpi slt, %68, %c0_i32_22 : i32
    %76 = vector.broadcast %75 : i1 to vector<1x290xi1>
    %77 = vector.broadcast %76 : vector<1x290xi1> to vector<1x290xi1>
    %78 = arith.xori %74, %77 : vector<1x290xi1>
    %79 = arith.andi %78, %72 : vector<1x290xi1>
    %80 = vector.broadcast %68 : i32 to vector<1x290xi32>
    %81 = arith.addi %70, %80 : vector<1x290xi32>
    %82 = arith.select %79, %81, %70 : vector<1x290xi1>, vector<1x290xi32>
    %c0_i32_23 = arith.constant 0 : i32
    %83 = vector.broadcast %c0_i32_23 : i32 to vector<1x290xi32>
    %84 = arith.cmpi ne, %82, %83 : vector<1x290xi32>
    %cst_24 = arith.constant 0.000000e+00 : f32
    %85 = vector.broadcast %cst_24 : f32 to vector<8x1xf32>
    %86 = vector.extract_strided_slice %45 {offsets = [0, 0], sizes = [8, 289], strides = [1, 1]} : vector<8x290xf32> to vector<8x289xf32>
    %87 = tpu.concatenate %85, %86 in 1 : vector<8x1xf32>, vector<8x289xf32> -> vector<8x290xf32>
    %cst_25 = arith.constant 0.000000e+00 : f32
    %88 = vector.shape_cast %66 : vector<1x290xi1> to vector<1x290xi1>
    %89 = vector.broadcast %88 : vector<1x290xi1> to vector<8x290xi1>
    %90 = vector.broadcast %cst_25 : f32 to vector<8x290xf32>
    %91 = arith.select %89, %87, %90 : vector<8x290xi1>, vector<8x290xf32>
    %92 = vector.extract_strided_slice %45 {offsets = [0, 1], sizes = [8, 289], strides = [1, 1]} : vector<8x290xf32> to vector<8x289xf32>
    %93 = tpu.concatenate %92, %85 in 1 : vector<8x289xf32>, vector<8x1xf32> -> vector<8x290xf32>
    %cst_26 = arith.constant 0.000000e+00 : f32
    %94 = vector.shape_cast %84 : vector<1x290xi1> to vector<1x290xi1>
    %95 = vector.broadcast %94 : vector<1x290xi1> to vector<8x290xi1>
    %96 = vector.broadcast %cst_26 : f32 to vector<8x290xf32>
    %97 = arith.select %95, %93, %96 : vector<8x290xi1>, vector<8x290xf32>
    %98 = tpu.concatenate %91, %45, %97 in 0 : vector<8x290xf32>, vector<8x290xf32>, vector<8x290xf32> -> vector<24x290xf32>
    %99 = arith.truncf %98 : vector<24x290xf32> to vector<24x290xbf16>
    %c0_27 = arith.constant 0 : index
    %c0_28 = arith.constant 0 : index
    %c0_29 = arith.constant 0 : index
    %100 = vector.load %arg4[%c0_27, %c0_28, %c0_29] : memref<3x8x24xbf16, #tpu.memory_space<vmem>>, vector<1x8x24xbf16>
    %101 = vector.shape_cast %100 : vector<1x8x24xbf16> to vector<8x24xbf16>
    %102 = vector.extract_strided_slice %99 {offsets = [0, 1], sizes = [24, 256], strides = [1, 1]} : vector<24x290xbf16> to vector<24x256xbf16>
    %cst_30 = arith.constant dense<0.000000e+00> : vector<8x256xf32>
    %103 = tpu.matmul %101, %102, %cst_30 {dimension_numbers = #tpu.dot_dimension_numbers<[1], [0], [0], [1], [0, 0, 1, 1], [], []>} : vector<8x24xbf16>, vector<24x256xbf16>, vector<8x256xf32> -> vector<8x256xf32>
    %c1 = arith.constant 1 : index
    %c0_31 = arith.constant 0 : index
    %c0_32 = arith.constant 0 : index
    %104 = vector.load %arg4[%c1, %c0_31, %c0_32] : memref<3x8x24xbf16, #tpu.memory_space<vmem>>, vector<1x8x24xbf16>
    %105 = vector.shape_cast %104 : vector<1x8x24xbf16> to vector<8x24xbf16>
    %106 = vector.extract_strided_slice %99 {offsets = [0, 17], sizes = [24, 256], strides = [1, 1]} : vector<24x290xbf16> to vector<24x256xbf16>
    %cst_33 = arith.constant dense<0.000000e+00> : vector<8x256xf32>
    %107 = tpu.matmul %105, %106, %cst_33 {dimension_numbers = #tpu.dot_dimension_numbers<[1], [0], [0], [1], [0, 0, 1, 1], [], []>} : vector<8x24xbf16>, vector<24x256xbf16>, vector<8x256xf32> -> vector<8x256xf32>
    %108 = arith.addf %103, %107 : vector<8x256xf32>
    %c2 = arith.constant 2 : index
    %c0_34 = arith.constant 0 : index
    %c0_35 = arith.constant 0 : index
    %109 = vector.load %arg4[%c2, %c0_34, %c0_35] : memref<3x8x24xbf16, #tpu.memory_space<vmem>>, vector<1x8x24xbf16>
    %110 = vector.shape_cast %109 : vector<1x8x24xbf16> to vector<8x24xbf16>
    %111 = vector.extract_strided_slice %99 {offsets = [0, 33], sizes = [24, 256], strides = [1, 1]} : vector<24x290xbf16> to vector<24x256xbf16>
    %cst_36 = arith.constant dense<0.000000e+00> : vector<8x256xf32>
    %112 = tpu.matmul %110, %111, %cst_36 {dimension_numbers = #tpu.dot_dimension_numbers<[1], [0], [0], [1], [0, 0, 1, 1], [], []>} : vector<8x24xbf16>, vector<24x256xbf16>, vector<8x256xf32> -> vector<8x256xf32>
    %113 = arith.addf %108, %112 : vector<8x256xf32>
    %c0_37 = arith.constant 0 : index
    %c0_38 = arith.constant 0 : index
    %114 = vector.load %arg6[%c0_37, %c0_38] : memref<24x1xf32, #tpu.memory_space<vmem>>, vector<8x1xf32>
    %115 = vector.broadcast %114 : vector<8x1xf32> to vector<8x256xf32>
    %116 = arith.addf %113, %115 : vector<8x256xf32>
    %cst_39 = arith.constant 0.000000e+00 : f32
    %117 = vector.broadcast %cst_39 : f32 to vector<8x256xf32>
    %118 = arith.maximumf %116, %117 : vector<8x256xf32>
    %c0_40 = arith.constant 0 : index
    %c0_41 = arith.constant 0 : index
    %119 = vector.load %arg5[%c0_40, %c0_41] : memref<16x8xbf16, #tpu.memory_space<vmem>>, vector<16x8xbf16>
    %120 = arith.truncf %118 : vector<8x256xf32> to vector<8x256xbf16>
    %cst_42 = arith.constant dense<0.000000e+00> : vector<16x256xf32>
    %121 = tpu.matmul %119, %120, %cst_42 {dimension_numbers = #tpu.dot_dimension_numbers<[1], [0], [0], [1], [0, 0, 1, 1], [], []>} : vector<16x8xbf16>, vector<8x256xbf16>, vector<16x256xf32> -> vector<16x256xf32>
    %c8 = arith.constant 8 : index
    %c0_43 = arith.constant 0 : index
    %122 = vector.load %arg6[%c8, %c0_43] : memref<24x1xf32, #tpu.memory_space<vmem>>, vector<16x1xf32>
    %123 = vector.broadcast %122 : vector<16x1xf32> to vector<16x256xf32>
    %124 = arith.addf %121, %123 : vector<16x256xf32>
    %cst_44 = arith.constant 0.000000e+00 : f32
    %125 = vector.broadcast %cst_44 : f32 to vector<16x256xf32>
    %126 = arith.maximumf %124, %125 : vector<16x256xf32>
    %127 = vector.shape_cast %126 : vector<16x256xf32> to vector<1x16x256xf32>
    %c0_45 = arith.constant 0 : index
    %c0_46 = arith.constant 0 : index
    %c0_47 = arith.constant 0 : index
    %128 = vector.load %arg7[%c0_45, %c0_46, %c0_47] : memref<1x16x256xf32, #tpu.memory_space<vmem>>, vector<1x16x256xf32>
    tpu.vector_store %arg7[%c0_45, %c0_46, %c0_47], %127 {strides = array<i32>} : memref<1x16x256xf32, #tpu.memory_space<vmem>>, vector<1x16x256xf32>,
    return
  }
  func.func @transform_0(%arg0: i32) -> (i32, i32, i32) {
    %c0_i32 = arith.constant 0 : i32
    %c0_i32_0 = arith.constant 0 : i32
    %c0_i32_1 = arith.constant 0 : i32
    return %arg0, %c0_i32, %c0_i32_0 : i32, i32, i32
  }
  func.func @transform_1(%arg0: i32) -> (i32, i32, i32, i32) {
    %c0_i32 = arith.constant 0 : i32
    %c0_i32_0 = arith.constant 0 : i32
    %c0_i32_1 = arith.constant 0 : i32
    %c0_i32_2 = arith.constant 0 : i32
    return %arg0, %c0_i32, %c0_i32_0, %c0_i32_1 : i32, i32, i32, i32
  }
  func.func @transform_2(%arg0: i32) -> (i32, i32) {
    %c0_i32 = arith.constant 0 : i32
    %c0_i32_0 = arith.constant 0 : i32
    %c0_i32_1 = arith.constant 0 : i32
    return %c0_i32, %c0_i32_0 : i32, i32
  }
  func.func @transform_3(%arg0: i32) -> (i32, i32, i32) {
    %c0_i32 = arith.constant 0 : i32
    %c0_i32_0 = arith.constant 0 : i32
    %c0_i32_1 = arith.constant 0 : i32
    %c0_i32_2 = arith.constant 0 : i32
    return %c0_i32, %c0_i32_0, %c0_i32_1 : i32, i32, i32
  }
  func.func @transform_4(%arg0: i32) -> (i32, i32) {
    %c0_i32 = arith.constant 0 : i32
    %c0_i32_0 = arith.constant 0 : i32
    %c0_i32_1 = arith.constant 0 : i32
    return %c0_i32, %c0_i32_0 : i32, i32
  }
  func.func @transform_5(%arg0: i32) -> (i32, i32) {
    %c0_i32 = arith.constant 0 : i32
    %c0_i32_0 = arith.constant 0 : i32
    %c0_i32_1 = arith.constant 0 : i32
    return %c0_i32, %c0_i32_0 : i32, i32
  }
  func.func @transform_6(%arg0: i32) -> (i32, i32, i32) {
    %c0_i32 = arith.constant 0 : i32
    %c0_i32_0 = arith.constant 0 : i32
    %c0_i32_1 = arith.constant 0 : i32
    return %arg0, %c0_i32, %c0_i32_0 : i32, i32, i32
  }
}

</mosaic_0001>

<bundles_post_ra>
// kernel: tpu_custom_call.1
= control target key start
LH: loop header
LB: loop body
LE: loop exit
PB: predicated region body
PF: predicated region fallthrough
CT: control target
= control target key end

     0   :  { %11 = vsyncpa [#allocation3], 0  ;;  %s1586_s0 = inlined_call_operand.vmem [shape: f32[2,4,256], index: 0, kind: input, shape index: {}]   ;;  %s1587_s1 = inlined_call_operand.hbm [shape: f32[2,4,8,8], index: 1, kind: input, shape index: {}]   ;;  %s1588_s2 = inlined_call_operand.vmem [shape: bf16[8,16], index: 2, kind: input, shape index: {}]   ;;  %s1589_s3 = inlined_call_operand.vmem [shape: bf16[3,8,24], index: 3, kind: input, shape index: {}]   ;;  %s1590_s4 = inlined_call_operand.vmem [shape: bf16[16,8], index: 4, kind: input, shape index: {}]   ;;  %s1591_s5 = inlined_call_operand.vmem [shape: f32[24,1], index: 5, kind: input, shape index: {}]   ;;  %s1592_s6 = inlined_call_operand.hbm [shape: f32[2,16,256], index: 6, kind: output, shape index: {}]  }
   0x1   :  { %13 = vsyncpa [#allocation3 + $0x1], 0 }
   0x2   :  { %14 = vsyncpa [#allocation4], 0 }
   0x3   :  { %16 = vsyncpa [#allocation4 + $0x1], 0  ;;  %s1307_s21 = smov 0   ;;  %s1309_s22 = smov 0  }
   0x4   :  { %s1311_s23 = smov 0   ;;  %s1313_s24 = smov 0  }
   0x5 LB: > { %s1328_s25 = sadd.s32 4294967295, %s1257_s24   ;;  %s1023_s26 = sadd.s32 4294967294, %s1257_s24   ;;  %s1257_s24 = sphi %s1313_s24, %s1608_s24   ;;  %s1253_s23 = sphi %s1311_s23, %s1607_s23   ;;  %s1249_s22 = sphi %s1309_s22, %s1606_s22   ;;  %s1245_s21 = sphi %s1307_s21, %s1605_s21  }
   0x6   : > { %s1332_s27 = sadd.s32 1, %s1257_s24   ;;  %s55_s28 = sadd.s32 1, %s1253_s23 }
   0x7   : > { %s52_s29 = ssub.s32 %s1257_s24, %s1332_s27  ;;  %p62_p0 = scmp.ne.s32.totalorder %s1253_s23, %s1249_s22 }
   0x8   : > { %p53_p1 = scmp.eq.s32.totalorder %s52_s29, 0  ;;  %p63_p2 = scmp.eq.s32.totalorder %s1257_s24, 0 }
   0x9   : > { %p68_p3 = scmp.ne.s32.totalorder %s1249_s22, %s1245_s21  ;;  %p69_p4 = scmp.eq.s32.totalorder %s1328_s25, 0 }
   0xa   : > { %s1344_s30 = scalar_select %p53_p1, %s1253_s23, %s55_s28  }
   0xb   : > { %p1346_p5 = por %p63_p2, %p62_p0  ;;  %p1350_p6 = por %p69_p4, %p68_p3 }
   0xc   : > { %p176_p7 = scmp.eq.s32.totalorder %s1328_s25, 1  ;;  %p182_p8 = scmp.eq.s32.totalorder %s1023_s26, 1 }
   0xd   : > { %p1071_p10 = scmp.lt.s32.totalorder %s1257_s24, 2  ;;  %s222_s11 = sand.u32 1, %s1253_s23  }
   0xe   : > { %p1357_p11 = por %p176_p7, %p62_p0  ;;  %p1361_p12 = por %p182_p8, %p68_p3 }
   0xf   : > { %s1055_s12 = sshll.u32 %s1257_s24, 5  ;;  %s1026_s13 = sshll.u32 %s222_s11, 5 }
  0x10   : > { %s231_s16 = scalar_lea.hbm %s1587_s1, %s1055_s12  ;;  %s226_s18 = scalar_lea.vmem [#allocation2], %s1026_s13 }
  0x11   : > { %s232_s17 = sshll.u32 %s231_s16, 4  ;;  %s234_s19 = sshll.u32 %s226_s18, 4  ;;  %s233_s17 = int_to_ptr.hbm [resolvable:$true] %s232_s17  ;;  %s235_s19 = int_to_ptr.vmem [resolvable:$true] %s234_s19 }
  0x12   : > { %p1372_p13 = pnand %p1071_p10, %p1346_p5  ;;  %p1029_p0 = scmp.ge.s32.totalorder %s1257_s24, 1 }
  0x13   : > { %p242_p1 = scmp.lt.s32.totalorder %s1257_s24, 3  ;;  %s223_s26 = scalar_lea.sflag [#allocation3], %s222_s11 }
  0x14   : > { %s1161_s28 = sshra.s32 %s233_s17, 4  ;;  %p1165_p3 = pneg %p1372_p13  ;;  %s1162_s28 = int_to_ptr.hbm [resolvable:$true] %s1161_s28 }
  0x15   : > { %s1163_s29 = scalar_lea.hbm %s1162_s28, 32  ;;  %s1168_s7 = scalar_lea.hbm %s1587_s1, 64 }
  0x16   : > { %p1164_p2 = scmp.ne.s32.totalorder %s1162_s28, %s1163_s29  ;;  %p1169_p5 = scmp.lt.s32.totalorder %s1162_s28, %s1587_s1 }
  0x17   : > { %p1170_p8 = scmp.lt.s32.totalorder %s1168_s7, %s1163_s29 }
  0x18   : > { %p1166_p4 = pnand %p1165_p3, %p1164_p2 }
  0x19   : > { %p1171_p10 = por %p1170_p8, %p1169_p5 }
  0x1a   : > { %p1167_p7 = pneg %p1166_p4 }
  0x1c   : > { %p1172_p9 = pnand %p1171_p10, %p1167_p7 }
  0x1e   : > { %1175 = shalt.err (!%p1172_p9)
}
  0x1f   : > { %s1259_s11 = smov 128   ;;  %s1260_s16 = smov 8  }
  0x20   : > { %1066 = dma.hbm_to_vmem [thread:$0]  (!%p1372_p13), %s233_s17, 512, %s235_s19, %s223_s26, %s1259_s11, %s1259_s11, %s1260_s16  }
  0x21   : > { %p243_p2 = pnand %p1029_p0, %p242_p1 }
  0x22   : > { %s1393_s18 = sand.u32 (!%p243_p2), 1, %s1249_s22  }
  0x23   : > { %246 = sbr.rel (%p243_p2) target bundleno = 1129 (0x469), region = 44  ;;  %s1030_s28 = sshll.u32 (!%p243_p2), %s1393_s18, 5 }
  0x24   : > { %s249_s29 = scalar_lea.sflag (!%p243_p2), [#allocation3], %s1393_s18  ;;  %s252_s12 = scalar_lea.vmem (!%p243_p2), [#allocation2], %s1030_s28 }
  0x28   : > { %1236 = dma.done.wait (%p1350_p6), %s249_s29, 512  }
  0x29   : > { %1238 = vsyncadd (%p1350_p6), %s249_s29, 4294966784  ;;  %vm307_vm0 = vcmask 1043456   ;;  %v299_v0 = vld [vmem:[%s1588_s2] sm:$0xf]  ;;  %v293_v1 = vld [vmem:[%s252_s12] sm:$0xff]  ;;  %vm300_vm1 = vcmask 64512  }
  0x2a   : > { %v294_v2 = vld [vmem:[%s252_s12 + $0x8] sm:$0xff]  ;;  %v309_v3 = vsel %vm307_vm0, %v299_v0, 0  ;;  %v295_v5 = vld [vmem:[%s252_s12 + $0x10] sm:$0xff]  ;;  %v296_v6 = vld [vmem:[%s252_s12 + $0x18] sm:$0xff]  ;;  %vm342_vm2 = vcmask 1040384   ;;  %vm355_vm3 = vcmask 1046528  }
  0x2b   : > { %v297_v4 = vpack.c.bf16 %v294_v2, %v293_v1  ;;  %318 = vmatpush.bf16.msra.mxu0 %v309_v3  ;;  %v298_v7 = vpack.c.bf16 %v296_v6, %v295_v5  ;;  %s1261_s8 = smov 16   ;;  %vm396_vm4 = vcmask 130048   ;;  %vm406_vm5 = vcmask 1041409   ;;  %s1262_s20 = smov 96  }
  0x2c   : > { %vm409_vm6 = vcmask 1042434   ;;  %vm412_vm7 = vcmask 1043459   ;;  %s1263_s26 = smov 32   ;;  %s1264_s13 = smov 64   ;;  %vm480_vm8 = vcmask 261120   ;;  %vm482_vm9 = vcmask 523264  }
  0x2d   : > { %p287_p6 = scmp.lt.s32.totalorder %s1328_s25, 1  ;;  %vm484_vm10 = vcmask 785408   ;;  %s1265_s29 = smov 17   ;;  %vm510_vm11 = vcmask 138240   ;;  %vm638_vm12 = vcmask 269312   ;;  %vm610_vm14 = vcmask 7168  }
  0x2e   : > { %1034 = vmatmul.msk.bf16.vlgmr.msra.gmra.mxu0 %vm300_vm1, %v297_v4  ;;  %s1266_s12 = smov 127   ;;  %s1267_s17 = smov 1  }
  0x2f   : > { %s288_s7 = scalar_select %p287_p6, %s1328_s25, 1 }
  0x30   : > { %s1268_s19 = smov 111  }
  0x31   : > { %s1056_s14 = sshll.u32 %s288_s7, 3  ;;  %s1058_s7 = sshll.u32 %s1328_s25, 5 }
  0x32   : > { %s291_s16 = scalar_lea.vmem %s1586_s0, %s1056_s14  ;;  %s286_s14 = scalar_lea.vmem [#allocation5], %s1030_s28 }
  0x33   : > { %s923_s25 = scalar_lea.sflag [#allocation4], %s1393_s18 }
  0x3e   : > { %1035 = vmatmul.msk.bf16.gmra.mxu0 %vm300_vm1, %v298_v7 }
  0xab   : > { %v320_v8 = vpop.f32.mrf.mxu0 }
  0xac   : > { %v334_v9 = vrot.slane %v320_v8, 7  ;;  %v347_v11 = vrot.slane %v320_v8, 1  ;;  %v360_v13 = vmul.f32 0.75, %v320_v8 }
  0xae   : > { %v343_v10 = vsel %vm342_vm2, %v320_v8, %v334_v9  ;;  %v356_v15 = vsel %vm355_vm3, %v347_v11, %v320_v8 }
  0xaf   : > { %v364_v12 = vmul.f32 0.25, %v343_v10  ;;  %v372_v19 = vmul.f32 0.25, %v356_v15 }
  0xb1   : > { %v368_v14 = vadd.f32 %v364_v12, %v360_v13  ;;  %v376_v25 = vadd.f32 %v372_v19, %v360_v13 }
  0xb3   : > { %v322_v16 = vpop.f32.mrf.mxu0 }
  0xb4   : > { %v335_v17 = vrot.slane %v322_v16, 7  ;;  %v348_v18 = vrot.slane %v322_v16, 1  ;;  %v361_v23 = vmul.f32 0.75, %v322_v16 }
  0xb6   : > { %v344_v20 = vsel %vm342_vm2, %v322_v16, %v335_v17  ;;  %v357_v21 = vsel %vm355_vm3, %v348_v18, %v322_v16 }
  0xb7   : > { %v365_v22 = vmul.f32 0.25, %v344_v20  ;;  %v373_v24 = vmul.f32 0.25, %v357_v21 }
  0xb9   : > { %v377_v26 = vadd.f32 %v373_v24, %v361_v23  ;;  %v369_v27 = vadd.f32 %v365_v22, %v361_v23 }
  0xbb   : > { %v325_v28 = vpop.f32.mrf.mxu0  ;;  %v1118_v29 = vpack.i.bf16 %v377_v26, %v376_v25 }
  0xbc   : > { %v336_v30 = vrot.slane %v325_v28, 7  ;;  %v349_v32 = vrot.slane %v325_v28, 1  ;;  %v362_v34 = vmul.f32 0.75, %v325_v28 }
  0xbd   : > { %1119 = vrot.lane.b32.xlu0 %v1118_v29, %s1261_s8 }
  0xbe   : > { %v345_v31 = vsel %vm342_vm2, %v325_v28, %v336_v30  ;;  %v358_v36 = vsel %vm355_vm3, %v349_v32, %v325_v28 }
  0xbf   : > { %v366_v33 = vmul.f32 0.25, %v345_v31  ;;  %v374_v39 = vmul.f32 0.25, %v358_v36 }
  0xc1   : > { %v370_v35 = vadd.f32 %v366_v33, %v362_v34  ;;  %v378_v43 = vadd.f32 %v374_v39, %v362_v34 }
  0xc3   : > { %v327_v37 = vpop.f32.mrf.mxu0 }
  0xc4   : > { %v350_v38 = vrot.slane %v327_v37, 1  ;;  %v363_v41 = vmul.f32 0.75, %v327_v37  ;;  %v337_v49 = vrot.slane %v327_v37, 7 }
  0xc6   : > { %v359_v40 = vsel %vm355_vm3, %v350_v38, %v327_v37  ;;  %v346_v9 = vsel %vm342_vm2, %v327_v37, %v337_v49  ;;  %vm632_vm2 = vcmask 1039360  }
  0xc7   : > { %v375_v42 = vmul.f32 0.25, %v359_v40  ;;  %v367_v11 = vmul.f32 0.25, %v346_v9 }
  0xc9   : > { %v379_v44 = vadd.f32 %v375_v42, %v363_v41  ;;  %v371_v13 = vadd.f32 %v367_v11, %v363_v41 }
  0xcb   : > { %v1123_v45 = vpack.i.bf16 %v379_v44, %v378_v43 }
  0xcd   : > { %1124 = vrot.lane.b32.xlu0 %v1123_v45, %s1261_s8 }
 0x12f   : > { %v1120_v46 = vpop.permute.xlu0 %1119 }
 0x130   : > { %v1122_v47 = vunpack.i.h.bf16 %v1120_v46  ;;  %v1121_v48 = vunpack.i.l.bf16 %v1120_v46 }
 0x132   : > { %v397_v50 = vsel %vm396_vm4, %v368_v14, %v1121_v48  ;;  %v398_v51 = vsel %vm396_vm4, %v369_v27, %v1122_v47 }
 0x133   : > { %v433_v52 = vrot.slane %v397_v50, 3  ;;  %v434_v53 = vrot.slane %v398_v51, 2  ;;  %v470_v54 = vrot.slane %v397_v50, 7  ;;  %v471_v55 = vrot.slane %v398_v51, 6 }
 0x134   : > { %v415_v56 = vrot.slane %v397_v50, 1  ;;  %v450_v57 = vrot.slane %v397_v50, 5  ;;  %v451_v58 = vrot.slane %v398_v51, 4  ;;  %v424_v59 = vrot.slane %v397_v50, 2 }
 0x135   : > { %v435_v60 = vsel %vm406_vm5, %v434_v53, %v433_v52  ;;  %v472_v61 = vsel %vm406_vm5, %v471_v55, %v470_v54  ;;  %v425_v62 = vrot.slane %v398_v51, 1  ;;  %v460_v63 = vrot.slane %v397_v50, 6 }
 0x136   : > { %v416_v0 = vsel %vm406_vm5, %v398_v51, %v415_v56  ;;  %v452_v1 = vsel %vm406_vm5, %v451_v58, %v450_v57  ;;  %v461_v2 = vrot.slane %v398_v51, 5  ;;  %v405_v3 = vrot.slane %v398_v51, 7 }
 0x137   : > { %v426_v4 = vsel %vm406_vm5, %v425_v62, %v424_v59  ;;  %v442_v5 = vrot.slane %v397_v50, 4  ;;  %v443_v6 = vrot.slane %v398_v51, 3  ;;  %v489_v51 = vld [vmem:[%s291_s16] sm:$0xff]  ;;  %s934_s16 = scalar_lea.hbm %s1592_s6, %s1058_s7 }
 0x138   : > { %v462_v7 = vsel %vm406_vm5, %v461_v2, %v460_v63  ;;  %v407_v8 = vsel %vm406_vm5, %v405_v3, %v397_v50  ;;  %491 = vst [vmem:[#allocation1] ss:$2 sm:$0xff] %v489_v51 }
 0x139   : > { %v444_v10 = vsel %vm406_vm5, %v443_v6, %v442_v5 }
 0x13f   : > { %v1125_v12 = vpop.permute.xlu0 %1124  ;;  %v492_v3 = vld.sshfl [vmem:[#allocation1] sm:$0xff pattern:$0x75316420] }
 0x140   : > { %v1127_v14 = vunpack.i.h.bf16 %v1125_v12  ;;  %v1126_v15 = vunpack.i.l.bf16 %v1125_v12 }
 0x142   : > { %v399_v16 = vsel %vm396_vm4, %v370_v35, %v1126_v15  ;;  %v400_v17 = vsel %vm396_vm4, %v371_v13, %v1127_v14 }
 0x143   : > { %v436_v18 = vrot.slane %v399_v16, 1  ;;  %v473_v19 = vrot.slane %v399_v16, 5  ;;  %v475_v20 = vrot.slane %v400_v17, 4  ;;  %v417_v21 = vrot.slane %v399_v16, 7 }
 0x144   : > { %v419_v22 = vrot.slane %v400_v17, 6  ;;  %v453_v23 = vrot.slane %v399_v16, 3  ;;  %v455_v24 = vrot.slane %v400_v17, 2  ;;  %v427_v25 = vsel %vm409_vm6, %v399_v16, %v426_v4  ;;  %v493_v4 = vld.sshfl [vmem:[#allocation1 + $0x8] sm:$0xff pattern:$0x75316420] }
 0x145   : > { %v437_v26 = vsel %vm409_vm6, %v436_v18, %v435_v60  ;;  %v474_v27 = vsel %vm409_vm6, %v473_v19, %v472_v61  ;;  %v418_v28 = vsel %vm409_vm6, %v417_v21, %v416_v0  ;;  %v428_v29 = vrot.slane %v400_v17, 7 }
 0x146   : > { %v438_v30 = vsel %vm412_vm7, %v400_v17, %v437_v26  ;;  %v476_v31 = vsel %vm412_vm7, %v475_v20, %v474_v27  ;;  %v420_v32 = vsel %vm412_vm7, %v419_v22, %v418_v28  ;;  %v454_v33 = vsel %vm409_vm6, %v453_v23, %v452_v1 }
 0x147   : > { %v1138_v34 = vpack.i.bf16 %v476_v31, %v438_v30  ;;  %v456_v35 = vsel %vm412_vm7, %v455_v24, %v454_v33  ;;  %v429_v36 = vsel %vm412_vm7, %v428_v29, %v427_v25  ;;  %v463_v37 = vrot.slane %v399_v16, 4 }
 0x148   : > { %v1128_v38 = vpack.i.bf16 %v456_v35, %v420_v32  ;;  %v465_v39 = vrot.slane %v400_v17, 3  ;;  %v408_v40 = vrot.slane %v399_v16, 6  ;;  %v445_v41 = vrot.slane %v399_v16, 2 }
 0x149   : > { %1139 = vrot.lane.b32.xlu2 %v1138_v34, %s1262_s20  ;;  %v464_v42 = vsel %vm409_vm6, %v463_v37, %v462_v7  ;;  %v447_v43 = vrot.slane %v400_v17, 1  ;;  %v411_v44 = vrot.slane %v400_v17, 5  ;;  %v517_v18 = vlaneseq  ;;  %s1269_s20 = smov 95  }
 0x14a   : > { %1129 = vrot.lane.b32.xlu1 %v1128_v38, %s1263_s26  ;;  %v466_v45 = vsel %vm412_vm7, %v465_v39, %v464_v42  ;;  %v410_v46 = vsel %vm409_vm6, %v408_v40, %v407_v8  ;;  %v446_v47 = vsel %vm409_vm6, %v445_v41, %v444_v10  ;;  %s1211_s26 = scalar_lea.hbm %s1592_s6, 64 }
 0x14b   : > { %v1133_v48 = vpack.i.bf16 %v466_v45, %v429_v36  ;;  %v448_v49 = vsel %vm412_vm7, %v447_v43, %v446_v47  ;;  %v413_v50 = vsel %vm412_vm7, %v411_v44, %v410_v46  ;;  %v518_v19 = vand.u32 127, %v517_v18 }
 0x14c   : > { %vm691_vm7 = vcmask 908288  }
 0x14d   : > { %v520_v20 = vadd.s32 256, %v518_v19  ;;  %v519_v21 = vadd.s32 128, %v518_v19  ;;  %v521_v23 = vadd.s32 15, %v518_v19  ;;  %v567_v26 = vand.u32 15, %v518_v19 }
 0x14f   : > { %v581_v22 = vand.u32 15, %v520_v20  ;;  %v522_v24 = vadd.s32 15, %v519_v21  ;;  %v574_v27 = vand.u32 15, %v519_v21  ;;  %v528_v28 = vand.u32 15, %v521_v23 }
 0x150   : > { %vm1462_vm15 = vcmp.ne.s32.totalorder %v567_v26, 0  ;;  %v523_v43 = vadd.s32 15, %v520_v20 }
 0x151   : > { %vm601_vm13 = vcmp.ne.s32.totalorder %v581_v22, 0  ;;  %v535_v29 = vand.u32 15, %v522_v24  ;;  %vm600_vm3 = vcmp.ne.s32.totalorder %v574_v27, 0  ;;  %vm1466_vm4 = vcmp.ne.s32.totalorder %v528_v28, 0  ;;  %v846_v24 = vld [vmem:[%s1591_s5] sm:$0xff] }
 0x152   : > { %1134 = vrot.lane.b32.xlu1 %v1133_v48, %s1264_s13 }
 0x153   : > { %vm1470_vm5 = vcmp.ne.s32.totalorder %v535_v29, 0 }
 0x1a3   : > { %v1140_v55 = vpop.permute.xlu2 %1139 }
 0x1a4   : > { %v1142_v59 = vunpack.i.h.bf16 %v1140_v55  ;;  %v1141_v60 = vunpack.i.l.bf16 %v1140_v55 }
 0x1bc   : > { %v1130_v52 = vpop.permute.xlu1 %1129 }
 0x1bd   : > { %v1132_v53 = vunpack.i.h.bf16 %v1130_v52  ;;  %v1131_v54 = vunpack.i.l.bf16 %v1130_v52 }
 0x1bf   : > { %v486_v61 = vsel %vm480_vm8, %v448_v49, %v1132_v53  ;;  %v481_v62 = vsel %vm480_vm8, %v413_v50, %v1131_v54  ;;  %v542_v54 = vand.u32 15, %v523_v43  ;;  %vm698_vm8 = vcmask 195584  }
 0x1c1   : > { %vm562_vm6 = vcmp.ne.s32.totalorder %v542_v54, 0  ;;  %v861_v54 = vld [vmem:[%s1591_s5 + $0x10] sm:$0xff] }
 0x1c4   : > { %v1135_v56 = vpop.permute.xlu1 %1134 }
 0x1c5   : > { %v1137_v57 = vunpack.i.h.bf16 %v1135_v56  ;;  %v1136_v58 = vunpack.i.l.bf16 %v1135_v56 }
 0x1c7   : > { %v483_v63 = vsel %vm482_vm9, %v481_v62, %v1136_v58  ;;  %v487_v0 = vsel %vm482_vm9, %v486_v61, %v1137_v57  ;;  %vm802_vm9 = vcmask 777216  }
 0x1c8   : > { %v485_v1 = vsel %vm484_vm10, %v483_v63, %v1141_v60  ;;  %v488_v2 = vsel %vm484_vm10, %v487_v0, %v1142_v59 }
 0x1c9   : > { %v498_v5 = vrot.slane %v485_v1, 4  ;;  %v499_v6 = vrot.slane %v488_v2, 4 }
 0x1cb   : > { %v502_v7 = vsel %vm307_vm0, %v492_v3, %v498_v5  ;;  %v503_v8 = vsel %vm307_vm0, %v493_v4, %v499_v6 }
 0x1cc   : > { %v1143_v9 = vpack.i.bf16 %v503_v8, %v502_v7 }
 0x1ce   : > { %1144 = vrot.lane.b32.xlu2 %v1143_v9, %s1265_s29  ;;  %s935_s29 = sshll.u32 %s286_s14, 4  ;;  %s936_s29 = int_to_ptr.vmem [resolvable:$true] %s935_s29 }
 0x228   : > { %v1145_v10 = vpop.permute.xlu2 %1144 }
 0x229   : > { %v1147_v11 = vunpack.i.h.bf16 %v1145_v10  ;;  %v1146_v12 = vunpack.i.l.bf16 %v1145_v10 }
 0x22b   : > { %v511_v13 = vsel %vm510_vm11, %v1146_v12, %v1147_v11  ;;  %v515_v14 = vsel %vm510_vm11, 0.0, %v1146_v12  ;;  %v1454_v15 = vsel %vm510_vm11, %v1147_v11, 0.0 }
 0x22c   : > { %v1456_v16 = vpack.c.bf16 %v511_v13, %v515_v14  ;;  %630 = vrot.lane.b32.xlu1 %v1454_v15, %s1266_s12  ;;  %v1153_v17 = vpack.i.bf16 %v511_v13, %v515_v14  ;;  %v652_v4 = vpack.c.bf16 %v1454_v15, %v1454_v15 }
 0x22e   : > { %1154 = vrot.lane.b32.xlu2 %v1153_v17, %s1267_s17  ;;  %1149 = vrot.lane.b32.xlu0 %v1153_v17, %s1266_s12  ;;  %v668_v0 = vunpack.c.h.b16 %v1456_v16  ;;  %v667_v5 = vunpack.c.l.b16 %v1456_v16  ;;  %v669_v8 = vunpack.c.l.b16 %v652_v4 }
 0x236   : > { %608 = vrot.lane.b32.xlu0 %v1454_v15, %s1267_s17 }
 0x288   : > { %v1155_v25 = vpop.permute.xlu2 %1154 }
 0x289   : > { %v1157_v30 = vunpack.i.h.bf16 %v1155_v25  ;;  %v1156_v31 = vunpack.i.l.bf16 %v1155_v25  ;;  %v1270_v25 = vmov 0  }
 0x28a   : > { %1158 = vset.pattern.permute.xlu1 %v1270_v25  ;;  %1160 = vset.pattern.permute.xlu0 %v1270_v25 }
 0x28b   : > { %v611_v42 = vsel %vm610_vm14, %v1156_v31, %v1157_v30  ;;  %v616_v44 = vsel %vm610_vm14, 0.0, %v1156_v31  ;;  %1159 = vset.pattern.permute.xlu2 %v1270_v25  ;;  %v655_v31 = vld [vmem:[%s1589_s3] sm:$0xf] }
 0x28c   : > { %v623_v52 = vsel %vm1466_vm4, %v616_v44, 0.0  ;;  %v624_v53 = vsel %vm1470_vm5, %v611_v42, 0.0 }
 0x28d   : > { %v649_v58 = vpack.c.bf16 %v624_v53, %v623_v52 }
 0x28f   : > { %v665_v62 = vunpack.c.h.b16 %v649_v58  ;;  %v664_v3 = vunpack.c.l.b16 %v649_v58 }
 0x291   : > { %v674_v2 = vpack.c.b16 %v668_v0, %v665_v62  ;;  %v673_v7 = vpack.c.b16 %v667_v5, %v664_v3 }
 0x29e   : > { %v631_v32 = vpop.permute.xlu1 %630 }
 0x29f   : > { %v639_v33 = vsel %vm638_vm12, %v631_v32, 0.0 }
 0x2a0   : > { %v648_v34 = vsel %vm601_vm13, %v639_v33, 0.0  ;;  %v1150_v36 = vpop.permute.xlu0 %1149 }
 0x2a1   : > { %v654_v37 = vpack.c.bf16 %v648_v34, %v648_v34  ;;  %v1152_v38 = vunpack.i.h.bf16 %v1150_v36  ;;  %v1151_v39 = vunpack.i.l.bf16 %v1150_v36 }
 0x2a3   : > { %v672_v45 = vunpack.c.l.b16 %v654_v37  ;;  %v634_v46 = vsel %vm632_vm2, %v1152_v38, %v631_v32  ;;  %v633_v47 = vsel %vm632_vm2, %v1151_v39, %v1152_v38 }
 0x2a4   : > { %v647_v48 = vsel %vm600_vm3, %v634_v46, 0.0  ;;  %v646_v49 = vsel %vm1462_vm15, %v633_v47, 0.0 }
 0x2a5   : > { %v678_v50 = vpack.c.b16 %v672_v45, %v672_v45  ;;  %v653_v51 = vpack.c.bf16 %v647_v48, %v646_v49 }
 0x2a7   : > { %689 = vrot.lane.b32.xlu2 %v678_v50, %s1268_s19  ;;  %v671_v55 = vunpack.c.h.b16 %v653_v51  ;;  %v670_v56 = vunpack.c.l.b16 %v653_v51 }
 0x2a8   : > { %v609_v57 = vpop.permute.xlu0 %608 }
 0x2a9   : > { %v677_v59 = vpack.c.b16 %v671_v55, %v671_v55  ;;  %v676_v60 = vpack.c.b16 %v670_v56, %v670_v56  ;;  %v612_v61 = vsel %vm610_vm14, %v1157_v30, %v609_v57  ;;  %v1036_v30 = vld [vmem:[%s1589_s3 + $0x4] sm:$0xf]  ;;  %v860_v55 = vld [vmem:[%s1591_s5 + $0x8] sm:$0xff] }
 0x2aa   : > { %v625_v63 = vsel %vm562_vm6, %v612_v61, 0.0 }
 0x2ab   : > { %687 = vrot.lane.b32.xlu1 %v677_v59, %s1268_s19  ;;  %740 = vrot.lane.b32.xlu0 %v676_v60, %s1266_s12  ;;  %v650_v1 = vpack.c.bf16 %v625_v63, %v625_v63 }
 0x2ad   : > { %v666_v6 = vunpack.c.l.b16 %v650_v1 }
 0x2af   : > { %685 = vrot.lane.b32.xlu2 %v676_v60, %s1268_s19  ;;  %v675_v9 = vpack.c.b16 %v669_v8, %v666_v6 }
 0x2b3   : > { %742 = vrot.lane.b32.xlu1 %v677_v59, %s1266_s12  ;;  %681 = vrot.lane.b32.xlu0 %v674_v2, %s1268_s19 }
 0x2b7   : > { %734 = vrot.lane.b32.xlu2 %v673_v7, %s1266_s12 }
 0x2bb   : > { %683 = vrot.lane.b32.xlu1 %v675_v9, %s1268_s19  ;;  %736 = vrot.lane.b32.xlu0 %v674_v2, %s1266_s12 }
 0x2bf   : > { %796 = vrot.lane.b32.xlu2 %v676_v60, %s1269_s20 }
 0x2c3   : > { %798 = vrot.lane.b32.xlu0 %v677_v59, %s1269_s20  ;;  %679 = vrot.lane.b32.xlu1 %v673_v7, %s1268_s19 }
 0x2c7   : > { %744 = vrot.lane.b32.xlu2 %v678_v50, %s1266_s12 }
 0x2cb   : > { %790 = vrot.lane.b32.xlu0 %v673_v7, %s1269_s20  ;;  %800 = vrot.lane.b32.xlu1 %v678_v50, %s1269_s20  ;;  %v1041_v50 = vld [vmem:[%s1589_s3 + $0x8] sm:$0xf] }
 0x2cf   : > { %794 = vrot.lane.b32.xlu2 %v675_v9, %s1269_s20 }
 0x2d3   : > { %738 = vrot.lane.b32.xlu0 %v675_v9, %s1266_s12  ;;  %792 = vrot.lane.b32.xlu1 %v674_v2, %s1269_s20  ;;  %s937_s12 = sshll.u32 %s934_s16, 4  ;;  %s938_s12 = int_to_ptr.hbm [resolvable:$true] %s937_s12 }
 0x2d4   : > { %s1205_s28 = sshra.s32 %s938_s12, 4  ;;  %s1206_s28 = int_to_ptr.hbm [resolvable:$true] %s1205_s28 }
 0x2d5   : > { %s1207_s17 = scalar_lea.hbm %s1206_s28, 32  ;;  %p1212_p1 = scmp.lt.s32.totalorder %s1206_s28, %s1592_s6 }
 0x2d6   : > { %p1208_p9 = scmp.ne.s32.totalorder %s1206_s28, %s1207_s17  ;;  %p1213_p3 = scmp.lt.s32.totalorder %s1211_s26, %s1207_s17 }
 0x2d7   : > { %864 = vperm.xlu2 %1159, %v860_v55  }
 0x2d8   : > { %p1209_p13 = pnand %p1208_p9, %p1357_p11  ;;  %p1214_p4 = por %p1213_p3, %p1212_p1 }
 0x2da   : > { %p1210_p0 = pneg %p1209_p13 }
 0x2db   : > { %849 = vperm.xlu1 %1158, %v846_v24   ;;  %869 = vperm.xlu0 %1160, %v861_v54  }
 0x2dc   : > { %p1215_p7 = pnand %p1214_p4, %p1210_p0 }
 0x301   : > { %v690_v10 = vpop.permute.xlu2 %689 }
 0x309   : > { %v686_v11 = vpop.permute.xlu2 %685 }
 0x311   : > { %v735_v16 = vpop.permute.xlu2 %734 }
 0x319   : > { %v797_v23 = vpop.permute.xlu2 %796 }
 0x31d   : > { %v688_v12 = vpop.permute.xlu1 %687  ;;  %v741_v13 = vpop.permute.xlu0 %740 }
 0x31e   : > { %v694_v14 = vsel %vm691_vm7, %v686_v11, %v688_v12  ;;  %v695_v15 = vsel %vm691_vm7, %v688_v12, %v690_v10 }
 0x31f   : > { %v703_v17 = vsel %vm307_vm0, %v694_v14, 0  ;;  %v706_v18 = vsel %vm307_vm0, %v695_v15, 0 }
 0x320   : > { %714 = vmatpush.bf16.msra.mxu1 %v703_v17  ;;  %727 = vmatpush.bf16.msra.mxu2 %v706_v18 }
 0x321   : > { %v745_v32 = vpop.permute.xlu2 %744 }
 0x325   : > { %v743_v19 = vpop.permute.xlu1 %742  ;;  %v682_v20 = vpop.permute.xlu0 %681 }
 0x326   : > { %v749_v21 = vsel %vm632_vm2, %v741_v13, %v743_v19  ;;  %v750_v33 = vsel %vm632_vm2, %v743_v19, %v745_v32  ;;  %v1057_v13 = vld [vmem:[%s1590_s4] sm:$0xff] }
 0x327   : > { %v757_v22 = vsel %vm307_vm0, %v749_v21, 0  ;;  %v760_v38 = vsel %vm307_vm0, %v750_v33, 0 }
 0x328   : > { %768 = vmatpush.bf16.msra.mxu3 %v757_v22 }
 0x329   : > { %v795_v44 = vpop.permute.xlu2 %794 }
 0x32d   : > { %v684_v26 = vpop.permute.xlu1 %683  ;;  %v737_v27 = vpop.permute.xlu0 %736 }
 0x32e   : > { %v693_v28 = vsel %vm691_vm7, %v682_v20, %v684_v26  ;;  %v747_v29 = vsel %vm632_vm2, %v735_v16, %v737_v27 }
 0x32f   : > { %728 = vmatpush.bf16.msra.mxu2 %v693_v28  ;;  %769 = vmatpush.bf16.msra.mxu3 %v747_v29 }
 0x331   : > { %v865_v15 = vpop.permute.xlu2 %864 }
 0x332   : > { %1038 = vmatmul.msk.bf16.vlgmr.msra.gmra.mxu2 %vm698_vm8, %v1036_v30  ;;  %1039 = vmatmul.msk.bf16.vlgmr.msra.gmra.mxu3 %vm698_vm8, %v655_v31 }
 0x335   : > { %v799_v34 = vpop.permute.xlu0 %798  ;;  %v680_v35 = vpop.permute.xlu1 %679 }
 0x336   : > { %v692_v36 = vsel %vm691_vm7, %v680_v35, %v682_v20  ;;  %v805_v37 = vsel %vm802_vm9, %v797_v23, %v799_v34 }
 0x337   : > { %715 = vmatpush.bf16.msra.mxu1 %v692_v36  ;;  %v813_v39 = vsel %vm307_vm0, %v805_v37, 0 }
 0x338   : > { %824 = vmatpush.bf16.msrb.mxu2 %v813_v39 }
 0x33a   : > { %1037 = vmatmul.msk.bf16.vlgmr.msra.gmra.mxu1 %vm698_vm8, %v1036_v30 }
 0x33b   : > { %781 = vmatpush.bf16.msrb.mxu1 %v760_v38 }
 0x33d   : > { %v791_v40 = vpop.permute.xlu0 %790  ;;  %v801_v41 = vpop.permute.xlu1 %800 }
 0x33e   : > { %v806_v42 = vsel %vm802_vm9, %v799_v34, %v801_v41 }
 0x33f   : > { %v816_v43 = vsel %vm307_vm0, %v806_v42, 0 }
 0x340   : > { %837 = vmatpush.bf16.msrb.mxu3 %v816_v43 }
 0x345   : > { %v739_v45 = vpop.permute.xlu0 %738  ;;  %v793_v46 = vpop.permute.xlu1 %792 }
 0x346   : > { %v748_v47 = vsel %vm632_vm2, %v737_v27, %v739_v45  ;;  %v803_v48 = vsel %vm802_vm9, %v791_v40, %v793_v46  ;;  %v804_v49 = vsel %vm802_vm9, %v793_v46, %v795_v44 }
 0x347   : > { %782 = vmatpush.bf16.msrb.mxu1 %v748_v47  ;;  %825 = vmatpush.bf16.msrb.mxu2 %v803_v48 }
 0x348   : > { %838 = vmatpush.bf16.msrb.mxu3 %v804_v49 }
 0x34a   : > { %1040 = vmatmul.msk.bf16.vlgmr.msrb.gmra.mxu1 %vm698_vm8, %v655_v31  ;;  %1042 = vmatmul.msk.bf16.vlgmr.msrb.gmra.mxu2 %vm698_vm8, %v1041_v50 }
 0x34b   : > { %1043 = vmatmul.msk.bf16.vlgmr.msrb.gmra.mxu3 %vm698_vm8, %v1041_v50 }
 0x34d   : > { %v850_v63 = vpop.permute.xlu1 %849  ;;  %v870_v22 = vpop.permute.xlu0 %869 }
 0x3b5   : > { %v730_v51 = vpop.f32.mrf.mxu2  ;;  %v771_v52 = vpop.f32.mrf.mxu3 }
 0x3b7   : > { %v717_v53 = vpop.f32.mrf.mxu1 }
 0x3b8   : > { %v772_v60 = vadd.f32 %v771_v52, %v717_v53 }
 0x3bd   : > { %v732_v56 = vpop.f32.mrf.mxu2  ;;  %v773_v57 = vpop.f32.mrf.mxu3 }
 0x3bf   : > { %v719_v58 = vpop.f32.mrf.mxu1 }
 0x3c7   : > { %v784_v59 = vpop.f32.mrf.mxu1 }
 0x3c8   : > { %v785_v61 = vadd.f32 %v784_v59, %v730_v51 }
 0x3cd   : > { %v827_v62 = vpop.f32.mrf.mxu2 }
 0x3ce   : > { %v844_v0 = vadd.f32 %v827_v62, %v772_v60  ;;  %v840_v1 = vpop.f32.mrf.mxu3 }
 0x3cf   : > { %v845_v2 = vadd.f32 %v840_v1, %v785_v61  ;;  %v786_v3 = vpop.f32.mrf.mxu1 }
 0x3d0   : > { %v852_v4 = vadd.f32 %v850_v63, %v844_v0 }
 0x3d1   : > { %v853_v5 = vadd.f32 %v850_v63, %v845_v2 }
 0x3d2   : > { %v854_v6 = vmax.f32 %v852_v4, 0.0 }
 0x3d3   : > { %v855_v7 = vmax.f32 %v853_v5, 0.0 }
 0x3d4   : > { %v858_v8 = vpack.c.bf16 %v854_v6, %v854_v6 }
 0x3d5   : > { %v859_v9 = vpack.c.bf16 %v855_v7, %v855_v7  ;;  %v829_v10 = vpop.f32.mrf.mxu2 }
 0x3d6   : > { %v881_v11 = vsel %vm307_vm0, %v858_v8, 0  ;;  %v842_v12 = vpop.f32.mrf.mxu3 }
 0x3d7   : > { %893 = vmatpush.bf16.msrb.mxu0 %v881_v11  ;;  %v884_v14 = vsel %vm307_vm0, %v859_v9, 0 }
 0x3d8   : > { %907 = vmatpush.bf16.msra.mxu1 %v884_v14 }
 0x3da   : > { %1048 = vmatmul.msk.bf16.vlgmr.msrb.gmra.mxu0 %vm300_vm1, %v1057_v13 }
 0x3db   : > { %1049 = vmatmul.msk.bf16.vlgmr.msra.gmra.mxu1 %vm300_vm1, %v1057_v13 }
 0x457   : > { %v895_v16 = vpop.f32.mrf.mxu0 }
 0x458   : > { %v909_v17 = vpop.f32.mrf.mxu1  ;;  %v896_v18 = vadd.f32 %v895_v16, %v865_v15 }
 0x459   : > { %v910_v19 = vadd.f32 %v909_v17, %v865_v15 }
 0x45a   : > { %v914_v20 = vmax.f32 %v896_v18, 0.0 }
 0x45b   : > { %v915_v21 = vmax.f32 %v910_v19, 0.0 }
 0x45c   : > { %918 = vst [vmem:[%s286_s14] sm:$0xff] %v914_v20 }
 0x45d   : > { %919 = vst [vmem:[%s286_s14 + $0x8] sm:$0xff] %v915_v21 }
 0x45f   : > { %v897_v23 = vpop.f32.mrf.mxu0 }
 0x460   : > { %v898_v24 = vadd.f32 %v897_v23, %v870_v22  ;;  %v911_v25 = vpop.f32.mrf.mxu1 }
 0x461   : > { %v912_v26 = vadd.f32 %v911_v25, %v870_v22 }
 0x462   : > { %v916_v27 = vmax.f32 %v898_v24, 0.0 }
 0x463   : > { %v917_v28 = vmax.f32 %v912_v26, 0.0 }
 0x464   : > { %920 = vst [vmem:[%s286_s14 + $0x10] sm:$0xff] %v916_v27 }
 0x465   : > { %921 = vst [vmem:[%s286_s14 + $0x18] sm:$0xff] %v917_v28 }
 0x466   : > { %1218 = shalt.err (!%p1215_p7)
}
 0x467   : > { %s1271_s18 = smov 256  }
 0x468   : > { %1061 = dma.vmem_to_hbm [thread:$0]  (%p1357_p11), %s936_s29, 512, %s938_s12, %s923_s25, %s1271_s18, %s1271_s18, %s1261_s8  }
 0x469 PF: > { %s952_s14 = sand.u32 1, %s1245_s21   ;;  %p1604_p5 = scmp.ge.s32.totalorder %s1257_s24, 2 }
 0x46a   : > { %s953_s15 = scalar_lea.sflag [#allocation4], %s952_s14 }
 0x46b   : > { %p1068_p8 = pnand %p1604_p5, %p1361_p12 }
 0x46d   : > { %p1069_p10 = pneg %p1068_p8 }
 0x46f   : > { %1240 = dma.done.wait (%p1069_p10), %s953_s15, 512  }
 0x470   : > { %1242 = vsyncadd (%p1069_p10), %s953_s15, 4294966784  ;;  %p19_p2 = scmp.ge.s32.totalorder %s1332_s27, 4   ;;  %s1605_s21 = smov %s1249_s22 }
 0x471   : > { %s1606_s22 = smov %s1253_s23  ;;  %s1607_s23 = smov %s1344_s30 }
 0x472   : > { %s1608_s24 = smov %s1332_s27  ;;  %21 = sbr.rel (!%p19_p2) target bundleno = 5 (0x5), region = 94 }
 0x477   :  { %959 = vsyncpa [#allocation3], 1 }
 0x478   :  { %961 = vsyncpa [#allocation3 + $0x1], 1 }
 0x479   :  { %962 = vsyncpa [#allocation4], 1 }
 0x47a   :  { %964 = vsyncpa [#allocation4 + $0x1], 1 }

</bundles_post_ra>
